<compile_context>
chip_gen: v7x
topology: tpu7x:2x2x1
jax: 0.10.0
libtpu: 0.0.40
codegen_flags: <defaults>
</compile_context>

<pallas_src>
import functools

import jax
import jax.numpy as jnp
from jax.experimental import pallas as pl
from jax.experimental.pallas import tpu as pltpu


def _subpix_conv_kernel(x_ref, m_ref, b_ref, o_ref, *, tile_h, k):
    """Row-matmul conv for one (batch, H-tile) grid point.

    x_ref : (Hp, K_LANES)        lane-flattened, zero-padded rows of one image
    m_ref : (k, K_LANES, N)      banded weight matrices, one per vertical tap
    b_ref : (1, N)               bias tiled along lanes (N = W_out*C_out)
    o_ref : (1, tile_h, N)       conv output rows [ht*tile_h, ht*tile_h+tile_h)
    """
    ht = pl.program_id(1)
    row0 = ht * tile_h
    if tile_h % 8 == 0:
        row0 = pl.multiple_of(row0, 8)

    n = o_ref.shape[2]
    acc = jnp.zeros((tile_h, n), dtype=jnp.float32)
    # Static unroll over the k vertical taps: each is a lane-dense MXU matmul
    # (K = K_LANES >= 128, N = W_out*C_out).  Horizontal taps + channel
    # contraction are folded into the banded matrix m_ref[kh].
    for kh in range(k):
        rows = x_ref[pl.ds(row0 + kh, tile_h), :]          # (tile_h, K_LANES)
        acc += jnp.dot(rows, m_ref[kh], preferred_element_type=jnp.float32)

    acc = acc + b_ref[...].astype(jnp.float32)             # (1, N) broadcast
    o_ref[0] = acc.astype(o_ref.dtype)                     # lane-dense store


def subpix_conv(x_nchw, weight, bias, *, upscale_factor=2, k=3, p=1,
                compute_dtype=None):
    """SubPixConv forward (Conv2d(k, s=1, p) + PixelShuffle(r)).

    x_nchw : (B, C_in, H, W)       NCHW (PyTorch convention)
    weight : (C_out, C_in, k, k)   PyTorch Conv2d weight layout
    bias   : (C_out,)
    returns: (B, C_out // r^2, H_out*r, W_out*r)  NCHW
    """
    B, C_in, H, W = x_nchw.shape
    C_out = weight.shape[0]
    r = upscale_factor
    assert C_out % (r * r) == 0

    Hp, Wp = H + 2 * p, W + 2 * p
    H_out, W_out = Hp - k + 1, Wp - k + 1          # stride-1 conv output size
    N = W_out * C_out
    k_lanes = ((Wp * C_in + 127) // 128) * 128     # pad contraction dim to 128
    cdt = compute_dtype if compute_dtype is not None else x_nchw.dtype

    # ---- glue in: lane-flattened padded rows (one fused transpose/pad pass) ----
    # x_rows[b, h', w'*C_in + ci] = x_padded[b, h', w', ci]
    x_nhwc = jnp.transpose(x_nchw, (0, 2, 3, 1)).reshape(B, H, W * C_in)
    x_rows = jnp.zeros((B, Hp, k_lanes), dtype=cdt)
    x_rows = x_rows.at[:, p:p + H, p * C_in:p * C_in + W * C_in].set(
        x_nhwc.astype(cdt))

    # ---- glue: banded weight matrices, one per vertical tap kh ----
    # M[kh, w'*C_in + ci, w*C_out + co] = weight[co, ci, kh, w' - w]
    #                                     for 0 <= w' - w < k, else 0.
    w_t = jnp.transpose(weight, (2, 3, 1, 0))      # (kh, kw, C_in, C_out)
    mats = []
    for kh in range(k):
        m = jnp.zeros((Wp * C_in, N), dtype=jnp.float32)
        for kw in range(k):
            shift = jnp.eye(Wp, W_out, k=-kw, dtype=jnp.float32)  # w' == w + kw
            m = m + jnp.kron(shift, w_t[kh, kw].astype(jnp.float32))
        mats.append(m)
    M = jnp.stack(mats)                                           # (k, Wp*C_in, N)
    M = jnp.pad(M, ((0, 0), (0, k_lanes - Wp * C_in), (0, 0))).astype(cdt)

    bias_row = jnp.tile(bias.astype(jnp.float32), W_out).reshape(1, N)

    # ---- grid: (batch, H tiles), both parallel ----
    tile_h = 8 if H_out % 8 == 0 else H_out
    grid = (B, H_out // tile_h)

    kernel = functools.partial(_subpix_conv_kernel, tile_h=tile_h, k=k)

    cost = pl.CostEstimate(
        flops=2 * B * H_out * k * k_lanes * N,
        transcendentals=0,
        bytes_accessed=(x_rows.size * x_rows.dtype.itemsize
                        + M.size * M.dtype.itemsize
                        + bias_row.size * 4
                        + B * H_out * N * x_nchw.dtype.itemsize),
    )

    conv_rows = pl.pallas_call(
        kernel,
        out_shape=jax.ShapeDtypeStruct((B, H_out, N), x_nchw.dtype),
        grid_spec=pltpu.PrefetchScalarGridSpec(
            num_scalar_prefetch=0,
            grid=grid,
            in_specs=[
                # whole padded row-image for this batch element (batch squeezed);
                # block index ignores ht -> fetched once per b, not per tile.
                pl.BlockSpec((None, Hp, k_lanes), lambda b, ht: (b, 0, 0)),
                # banded weights / bias: constant block -> fetched once.
                pl.BlockSpec((k, k_lanes, N), lambda b, ht: (0, 0, 0)),
                pl.BlockSpec((1, N), lambda b, ht: (0, 0)),
            ],
            out_specs=pl.BlockSpec((1, tile_h, N), lambda b, ht: (b, ht, 0)),
        ),
        compiler_params=pltpu.CompilerParams(
            dimension_semantics=("parallel", "parallel"),
            vmem_limit_bytes=32 * 1024 * 1024,
        ),
        cost_estimate=cost,
    )(x_rows, M, bias_row)                         # (B, H_out, W_out*C_out)

    # ---- glue out: PixelShuffle(r), matching PyTorch NCHW semantics ----
    # out[n, c, h*r+i, w*r+j] = conv[n, h, w, c*r*r + i*r + j]
    C_small = C_out // (r * r)
    y = conv_rows.reshape(B, H_out, W_out, C_small, r, r)
    y = jnp.transpose(y, (0, 3, 1, 4, 2, 5))       # (B, c, H, i, W, j)
    return y.reshape(B, C_small, H_out * r, W_out * r)


if __name__ == "__main__":
    key = jax.random.PRNGKey(0)
    B, C_in, H, W = 2, 4, 16, 16
    r, k, p = 2, 3, 1
    C_out = C_in * r * r

    kx, kw_, kb = jax.random.split(key, 3)
    x = jax.random.normal(kx, (B, C_in, H, W), dtype=jnp.float32)
    # Deterministic synthetic parameters (module's init_weights is not loaded).
    weight = 0.1 * jax.random.normal(kw_, (C_out, C_in, k, k), dtype=jnp.float32)
    bias = 0.05 * jax.random.normal(kb, (C_out,), dtype=jnp.float32)

    fwd = jax.jit(functools.partial(subpix_conv, upscale_factor=r, k=k, p=p))
    out = jax.block_until_ready(fwd(x, weight, bias))

    # Sanity-check against a pure-JAX reference (conv + pixel shuffle).
    ref_conv = jax.lax.conv_general_dilated(
        x, weight, window_strides=(1, 1), padding=((p, p), (p, p)),
        dimension_numbers=("NCHW", "OIHW", "NCHW"),
        precision=jax.lax.Precision.HIGHEST) + bias[None, :, None, None]
    ref = ref_conv.reshape(B, C_out // (r * r), r, r, H, W)
    ref = jnp.transpose(ref, (0, 1, 4, 2, 5, 3)).reshape(
        B, C_out // (r * r), H * r, W * r)

    assert out.shape == (B, C_out // (r * r), H * r, W * r)
    assert jnp.allclose(out, ref, atol=1e-4, rtol=1e-4)

    print("KERNEL_OK")
</pallas_src>

<mosaic_0001>
module attributes {stable_mosaic.version = 11 : i64} {
  func.func @_subpix_conv_kernel(%arg0: i32, %arg1: i32, %arg2: memref<1x18x128xf32, #tpu.memory_space<vmem>>, %arg3: memref<3x128x256xf32, #tpu.memory_space<vmem>>, %arg4: memref<1x256xf32, #tpu.memory_space<vmem>>, %arg5: memref<1x8x256xf32, #tpu.memory_space<vmem>>) attributes {dimension_semantics = [#tpu.dimension_semantics<parallel>, #tpu.dimension_semantics<parallel>], iteration_bounds = array<i64: 2, 2>, scalar_prefetch = 0 : i64, scratch_operands = 0 : i64, tpu.core_type = #tpu.core_type<tc>, window_params = [{transform_indices = @transform_0, window_bounds = array<i64: 1, 18, 128>}, {pipeline_mode = #tpu.pipeline_mode<synchronous>, transform_indices = @transform_1, window_bounds = array<i64: 3, 128, 256>}, {pipeline_mode = #tpu.pipeline_mode<synchronous>, transform_indices = @transform_2, window_bounds = array<i64: 1, 256>}, {transform_indices = @transform_3, window_bounds = array<i64: 1, 8, 256>}]} {
    %c8_i32 = arith.constant 8 : i32
    %0 = arith.muli %arg1, %c8_i32 : i32
    %1 = tpu.assume_multiple %0, 8 : i32
    %cst = arith.constant 0.000000e+00 : f32
    %2 = vector.broadcast %cst : f32 to vector<8x256xf32>
    %c0_i32 = arith.constant 0 : i32
    %3 = arith.addi %1, %c0_i32 : i32
    %c0 = arith.constant 0 : index
    %4 = arith.index_cast %3 : i32 to index
    %c0_0 = arith.constant 0 : index
    %5 = vector.load %arg2[%c0, %4, %c0_0] : memref<1x18x128xf32, #tpu.memory_space<vmem>>, vector<1x8x128xf32>
    %6 = vector.shape_cast %5 : vector<1x8x128xf32> to vector<8x128xf32>
    %c0_1 = arith.constant 0 : index
    %c0_2 = arith.constant 0 : index
    %c0_3 = arith.constant 0 : index
    %7 = vector.load %arg3[%c0_1, %c0_2, %c0_3] : memref<3x128x256xf32, #tpu.memory_space<vmem>>, vector<1x128x256xf32>
    %8 = vector.shape_cast %7 : vector<1x128x256xf32> to vector<128x256xf32>
    %cst_4 = arith.constant dense<0.000000e+00> : vector<8x256xf32>
    %9 = tpu.matmul %6, %8, %cst_4 {dimension_numbers = #tpu.dot_dimension_numbers<[1], [0], [0], [1], [0, 0, 1, 1], [], []>} : vector<8x128xf32>, vector<128x256xf32>, vector<8x256xf32> -> vector<8x256xf32>
    %10 = arith.addf %2, %9 : vector<8x256xf32>
    %c1_i32 = arith.constant 1 : i32
    %11 = arith.addi %1, %c1_i32 : i32
    %c0_5 = arith.constant 0 : index
    %12 = arith.index_cast %11 : i32 to index
    %c0_6 = arith.constant 0 : index
    %13 = vector.load %arg2[%c0_5, %12, %c0_6] : memref<1x18x128xf32, #tpu.memory_space<vmem>>, vector<1x8x128xf32>
    %14 = vector.shape_cast %13 : vector<1x8x128xf32> to vector<8x128xf32>
    %c1 = arith.constant 1 : index
    %c0_7 = arith.constant 0 : index
    %c0_8 = arith.constant 0 : index
    %15 = vector.load %arg3[%c1, %c0_7, %c0_8] : memref<3x128x256xf32, #tpu.memory_space<vmem>>, vector<1x128x256xf32>
    %16 = vector.shape_cast %15 : vector<1x128x256xf32> to vector<128x256xf32>
    %cst_9 = arith.constant dense<0.000000e+00> : vector<8x256xf32>
    %17 = tpu.matmul %14, %16, %cst_9 {dimension_numbers = #tpu.dot_dimension_numbers<[1], [0], [0], [1], [0, 0, 1, 1], [], []>} : vector<8x128xf32>, vector<128x256xf32>, vector<8x256xf32> -> vector<8x256xf32>
    %18 = arith.addf %10, %17 : vector<8x256xf32>
    %c2_i32 = arith.constant 2 : i32
    %19 = arith.addi %1, %c2_i32 : i32
    %c0_10 = arith.constant 0 : index
    %20 = arith.index_cast %19 : i32 to index
    %c0_11 = arith.constant 0 : index
    %21 = vector.load %arg2[%c0_10, %20, %c0_11] : memref<1x18x128xf32, #tpu.memory_space<vmem>>, vector<1x8x128xf32>
    %22 = vector.shape_cast %21 : vector<1x8x128xf32> to vector<8x128xf32>
    %c2 = arith.constant 2 : index
    %c0_12 = arith.constant 0 : index
    %c0_13 = arith.constant 0 : index
    %23 = vector.load %arg3[%c2, %c0_12, %c0_13] : memref<3x128x256xf32, #tpu.memory_space<vmem>>, vector<1x128x256xf32>
    %24 = vector.shape_cast %23 : vector<1x128x256xf32> to vector<128x256xf32>
    %cst_14 = arith.constant dense<0.000000e+00> : vector<8x256xf32>
    %25 = tpu.matmul %22, %24, %cst_14 {dimension_numbers = #tpu.dot_dimension_numbers<[1], [0], [0], [1], [0, 0, 1, 1], [], []>} : vector<8x128xf32>, vector<128x256xf32>, vector<8x256xf32> -> vector<8x256xf32>
    %26 = arith.addf %18, %25 : vector<8x256xf32>
    %c0_15 = arith.constant 0 : index
    %c0_16 = arith.constant 0 : index
    %27 = vector.load %arg4[%c0_15, %c0_16] : memref<1x256xf32, #tpu.memory_space<vmem>>, vector<1x256xf32>
    %28 = vector.broadcast %27 : vector<1x256xf32> to vector<8x256xf32>
    %29 = arith.addf %26, %28 : vector<8x256xf32>
    %c0_17 = arith.constant 0 : index
    %c0_18 = arith.constant 0 : index
    %c0_19 = arith.constant 0 : index
    %30 = vector.load %arg5[%c0_17, %c0_18, %c0_19] : memref<1x8x256xf32, #tpu.memory_space<vmem>>, vector<1x8x256xf32>
    %31 = vector.shape_cast %30 : vector<1x8x256xf32> to vector<8x256xf32>
    %32 = vector.shape_cast %29 : vector<8x256xf32> to vector<1x8x256xf32>
    tpu.vector_store %arg5[%c0_17, %c0_18, %c0_19], %32 {strides = array<i32>} : memref<1x8x256xf32, #tpu.memory_space<vmem>>, vector<1x8x256xf32>,
    return
  }
  func.func @transform_0(%arg0: i32, %arg1: i32) -> (i32, i32, i32) {
    %c0_i32 = arith.constant 0 : i32
    %c0_i32_0 = arith.constant 0 : i32
    %c0_i32_1 = arith.constant 0 : i32
    return %arg0, %c0_i32, %c0_i32_0 : i32, i32, i32
  }
  func.func @transform_1(%arg0: i32, %arg1: i32) -> (i32, i32, i32) {
    %c0_i32 = arith.constant 0 : i32
    %c0_i32_0 = arith.constant 0 : i32
    %c0_i32_1 = arith.constant 0 : i32
    %c0_i32_2 = arith.constant 0 : i32
    return %c0_i32, %c0_i32_0, %c0_i32_1 : i32, i32, i32
  }
  func.func @transform_2(%arg0: i32, %arg1: i32) -> (i32, i32) {
    %c0_i32 = arith.constant 0 : i32
    %c0_i32_0 = arith.constant 0 : i32
    %c0_i32_1 = arith.constant 0 : i32
    return %c0_i32, %c0_i32_0 : i32, i32
  }
  func.func @transform_3(%arg0: i32, %arg1: i32) -> (i32, i32, i32) {
    %c0_i32 = arith.constant 0 : i32
    %c0_i32_0 = arith.constant 0 : i32
    return %arg0, %arg1, %c0_i32 : i32, i32, i32
  }
}

</mosaic_0001>

<bundles_post_ra>
// kernel: tile.8
= control target key start
LH: loop header
LB: loop body
LE: loop exit
PB: predicated region body
PF: predicated region fallthrough
CT: control target
= control target key end

     0   :  { %s28_s0 = inlined_call_operand.vmem [shape: f32[16], index: 0, kind: input, shape index: {}]   ;;  %s29_s1 = inlined_call_operand.vmem [shape: f32[16,16], index: 1, kind: output, shape index: {}]  }
   0x1   :  { %v4_v0 = vld [vmem:[%s28_s0] ss:$0 sm:$0xff] }
   0x2   :  { %5 = vst [vmem:[%s29_s1] sm:$0xff] %v4_v0  ;;  %8 = vst [vmem:[%s29_s1 + $0x8] sm:$0xff] %v4_v0 }

// kernel: tile.9
= control target key start
LH: loop header
LB: loop body
LE: loop exit
PB: predicated region body
PF: predicated region fallthrough
CT: control target
= control target key end

     0   :  { %s7_s6 = smov 3  ;;  %s21_s9 = smov 3  ;;  %vm4_vm0 = vcmask 130048   ;;  %vm11_vm1 = vcmask 1048448   ;;  %vm18_vm2 = vcmask 917248   ;;  %vm25_vm3 = vcmask 786048   ;;  %s128_s0 = inlined_call_operand.vmem [shape: f32[16,16], index: 0, kind: input, shape index: {}]   ;;  %s129_s1 = inlined_call_operand.vmem [shape: f32[1,256], index: 1, kind: output, shape index: {}]  }
   0x1   :  { %v66_v0 = vld [vmem:[%s128_s0 + $0x7] ss:$8 sm:%s7_s6]   ;;  %s81_s10 = smov 112   ;;  %v68_v1 = vld [vmem:[%s128_s0 + $0x5] ss:$8 sm:%s21_s9]   ;;  %s14_s13 = smov 3 }
   0x2   :  { %9 = vrot.lane.b32.xlu0 %v66_v0, %s81_s10  ;;  %s82_s14 = smov 80   ;;  %v67_v2 = vld [vmem:[%s128_s0 + $0x6] ss:$8 sm:%s14_s13]   ;;  %s28_s17 = smov 3  ;;  %vm32_vm4 = vcmask 654848   ;;  %vm39_vm5 = vcmask 523648  }
   0x3   :  { %23 = vrot.lane.b32.xlu1 %v68_v1, %s82_s14  ;;  %v69_v3 = vld [vmem:[%s128_s0 + $0x4] ss:$8 sm:%s28_s17]   ;;  %s35_s20 = smov 3  ;;  %s42_s21 = smov 3  ;;  %vm46_vm6 = vcmask 392448   ;;  %vm53_vm7 = vcmask 261248  }
   0x4   :  { %s83_s22 = smov 96   ;;  %s84_s23 = smov 64   ;;  %v70_v4 = vld [vmem:[%s128_s0 + $0x3] ss:$8 sm:%s35_s20]   ;;  %v71_v5 = vld [vmem:[%s128_s0 + $0x2] ss:$8 sm:%s42_s21]  }
   0x5   :  { %s2_s26 = smov 3  ;;  %s49_s29 = smov 3 }
   0x6   :  { %16 = vrot.lane.b32.xlu0 %v67_v2, %s83_s22  ;;  %v3_v6 = vld [vmem:[%s128_s0] ss:$8 sm:%s2_s26]   ;;  %s85_s3 = smov 48   ;;  %s86_s4 = smov 32  }
   0x7   :  { %30 = vrot.lane.b32.xlu1 %v69_v3, %s84_s23  ;;  %5 = vst.msk [vmem:[#allocation0] ss:$8 sm:$0x3] %vm4_vm0, %v3_v6   ;;  %v72_v7 = vld [vmem:[%s128_s0 + $0x1] ss:$8 sm:%s49_s29]   ;;  %s87_s0 = smov 16  }
   0xa   :  { %37 = vrot.lane.b32.xlu0 %v70_v4, %s85_s3 }
   0xb   :  { %44 = vrot.lane.b32.xlu1 %v71_v5, %s86_s4 }
   0xe   :  { %51 = vrot.lane.b32.xlu0 %v72_v7, %s87_s0 }
  0x74   :  { %v10_v8 = vpop.permute.xlu0 %9  }
  0x75   :  { %12 = vst.msk [vmem:[#allocation0] ss:$8 sm:$0x3] %vm11_vm1, %v10_v8   ;;  %v24_v9 = vpop.permute.xlu1 %23  }
  0x78   :  { %v17_v10 = vpop.permute.xlu0 %16  }
  0x79   :  { %19 = vst.msk [vmem:[#allocation0] ss:$8 sm:$0x3] %vm18_vm2, %v17_v10   ;;  %v31_v11 = vpop.permute.xlu1 %30  }
  0x7a   :  { %26 = vst.msk [vmem:[#allocation0] ss:$8 sm:$0x3] %vm25_vm3, %v24_v9  }
  0x7b   :  { %33 = vst.msk [vmem:[#allocation0] ss:$8 sm:$0x3] %vm32_vm4, %v31_v11  }
  0x7c   :  { %v38_v12 = vpop.permute.xlu0 %37  }
  0x7d   :  { %40 = vst.msk [vmem:[#allocation0] ss:$8 sm:$0x3] %vm39_vm5, %v38_v12   ;;  %v45_v13 = vpop.permute.xlu1 %44  }
  0x7e   :  { %47 = vst.msk [vmem:[#allocation0] ss:$8 sm:$0x3] %vm46_vm6, %v45_v13  }
  0x80   :  { %v52_v14 = vpop.permute.xlu0 %51  }
  0x81   :  { %54 = vst.msk [vmem:[#allocation0] ss:$8 sm:$0x3] %vm53_vm7, %v52_v14  }
  0x88   :  { %v58_v15 = vld [vmem:[#allocation0] sm:$0x1]  ;;  %v62_v16 = vld [vmem:[#allocation0 + $0x8] sm:$0x1] }
  0x89   :  { %60 = vst [vmem:[%s129_s1] sm:$0x1] %v58_v15  ;;  %73 = vst [vmem:[%s129_s1 + $0x1] sm:$0x1] %v62_v16 }

// kernel: subpix_conv.1
= control target key start
LH: loop header
LB: loop body
LE: loop exit
PB: predicated region body
PF: predicated region fallthrough
CT: control target
= control target key end

     0   :  { %s908_s12 = smov 0   ;;  %s910_s13 = smov 0   ;;  %s1273_s0 = inlined_call_operand.vmem [shape: f32[2,18,128], index: 0, kind: input, shape index: {}]   ;;  %s1274_s1 = inlined_call_operand.vmem [shape: f32[3,128,256], index: 1, kind: input, shape index: {}]   ;;  %s1275_s2 = inlined_call_operand.vmem [shape: f32[1,256], index: 2, kind: input, shape index: {}]   ;;  %s1276_s3 = inlined_call_operand.vmem [shape: f32[2,16,256], index: 3, kind: output, shape index: {}]  }
   0x1   :  { %s912_s14 = smov 0   ;;  %s914_s15 = smov 0  }
   0x2   :  { %s916_s16 = smov 0  }
   0x3 LB: > { %s22_s17 = sadd.s32 1, %s877_s14  ;;  %s25_s18 = sadd.s32 1, %s881_s15  ;;  %s885_s16 = sphi %s916_s16, %s13_s16   ;;  %s881_s15 = sphi %s914_s15, %s1280_s15   ;;  %s877_s14 = sphi %s912_s14, %s1279_s14   ;;  %s873_s13 = sphi %s910_s13, %s1278_s13   ;;  %s869_s12 = sphi %s908_s12, %s1277_s12  }
   0x4   : > { %p23_p0 = scmp.ge.s32.totalorder %s22_s17, 2  ;;  %p629_p1 = scmp.ge.s32.totalorder %s885_s16, 1 }
   0x5   : > { %p151_p2 = scmp.lt.s32.totalorder %s885_s16, 5 }
   0x6   : > { %s1282_s17 = smov (%p23_p0, %s22_s17), 0  ;;  %s1284_s18 = smov (!%p23_p0, %s25_s18), %s881_s15 }
   0x7   : > { %p152_p3 = pnand %p629_p1, %p151_p2  ;;  %p27_p4 = scmp.ge.s32.totalorder %s1284_s18, 2 }
   0x8   : > { %v197_v0 = vld [vmem:[%s1274_s1 + $0x8] sm:$0xff] (!%p152_p3)  ;;  %v199_v1 = vld [vmem:[%s1274_s1 + $0x18] sm:$0xff] (!%p152_p3)  ;;  %v196_v2 = vld [vmem:[%s1274_s1] sm:$0xff] (!%p152_p3)  ;;  %v887_v7 = vmov (!%p152_p3), 0.0   ;;  %p179_p5 = scmp.lt.s32.totalorder (!%p152_p3), %s873_s13, 1  ;;  %s634_s28 = sshll.u32 (!%p152_p3), %s869_s12, 3 }
   0x9   : > { %s1286_s18 = smov (%p27_p4, %s1284_s18), 0  ;;  %155 = sbr.rel (%p152_p3) target bundleno = 294 (0x126), region = 32 }
   0xa   : > { %v737_v3 = vpack.c.bf16 (!%p152_p3), %v199_v1, %v197_v0  ;;  %v198_v4 = vld [vmem:[%s1274_s1 + $0x10] sm:$0xff] (!%p152_p3)  ;;  %v201_v5 = vld [vmem:[%s1274_s1 + $0x28] sm:$0xff] (!%p152_p3)  ;;  %v203_v6 = vld [vmem:[%s1274_s1 + $0x38] sm:$0xff] (!%p152_p3)  ;;  %399 = vmatprep.mubr.f32.mxu0 (!%p152_p3), %v887_v7  ;;  %328 = vmatprep.mubr.f32.mxu1 (!%p152_p3), %v887_v7  ;;  %p186_p6 = scmp.lt.s32.totalorder (!%p152_p3), %s869_s12, 1 }
   0xb   : > { %v739_v8 = vpack.c.bf16 (!%p152_p3), %v198_v4, %v196_v2  ;;  %v741_v9 = vpack.c.bf16 (!%p152_p3), %v203_v6, %v201_v5  ;;  %v200_v10 = vld [vmem:[%s1274_s1 + $0x20] sm:$0xff] (!%p152_p3)  ;;  %v202_v11 = vld [vmem:[%s1274_s1 + $0x30] sm:$0xff] (!%p152_p3)  ;;  %v205_v12 = vld [vmem:[%s1274_s1 + $0x48] sm:$0xff] (!%p152_p3) }
   0xc   : > { %738 = vmatprep.subr.bf16.mxu0 (!%p152_p3), %v737_v3  ;;  %v207_v13 = vld [vmem:[%s1274_s1 + $0x58] sm:$0xff] (!%p152_p3)  ;;  %v743_v14 = vpack.c.bf16 (!%p152_p3), %v202_v11, %v200_v10  ;;  %v204_v16 = vld [vmem:[%s1274_s1 + $0x40] sm:$0xff] (!%p152_p3)  ;;  %v206_v17 = vld [vmem:[%s1274_s1 + $0x50] sm:$0xff] (!%p152_p3) }
   0xd   : > { %740 = vmatpush1.bf16.msra.mxu0 (!%p152_p3), %v739_v8  ;;  %v745_v15 = vpack.c.bf16 (!%p152_p3), %v207_v13, %v205_v12  ;;  %v209_v18 = vld [vmem:[%s1274_s1 + $0x68] sm:$0xff] (!%p152_p3)  ;;  %v211_v19 = vld [vmem:[%s1274_s1 + $0x78] sm:$0xff] (!%p152_p3)  ;;  %v747_v20 = vpack.c.bf16 (!%p152_p3), %v206_v17, %v204_v16  ;;  %v208_v22 = vld [vmem:[%s1274_s1 + $0x60] sm:$0xff] (!%p152_p3) }
   0xe   : > { %742 = vmatprep.subr.bf16.mxu0 (!%p152_p3), %v741_v9  ;;  %v749_v21 = vpack.c.bf16 (!%p152_p3), %v211_v19, %v209_v18  ;;  %v210_v23 = vld [vmem:[%s1274_s1 + $0x70] sm:$0xff] (!%p152_p3)  ;;  %v213_v24 = vld [vmem:[%s1274_s1 + $0x88] sm:$0xff] (!%p152_p3)  ;;  %v215_v25 = vld [vmem:[%s1274_s1 + $0x98] sm:$0xff] (!%p152_p3) }
   0xf   : > { %v638_v26 = vld [vmem:[%s1274_s1 + $0x108] sm:$0xff] (!%p152_p3)  ;;  %v640_v27 = vld [vmem:[%s1274_s1 + $0x118] sm:$0xff] (!%p152_p3)  ;;  %v637_v28 = vld [vmem:[%s1274_s1 + $0x100] sm:$0xff] (!%p152_p3)  ;;  %v751_v30 = vpack.c.bf16 (!%p152_p3), %v210_v23, %v208_v22  ;;  %v753_v35 = vpack.c.bf16 (!%p152_p3), %v215_v25, %v213_v24 }
  0x10   : > { %v639_v29 = vld [vmem:[%s1274_s1 + $0x110] sm:$0xff]  ;;  %v212_v31 = vld [vmem:[%s1274_s1 + $0x80] sm:$0xff]  ;;  %v705_v33 = vpack.c.bf16 %v640_v27, %v638_v26  ;;  %v217_v36 = vld [vmem:[%s1274_s1 + $0xa8] sm:$0xff]  ;;  %s1288_s13 = smov (!%p179_p5, %s873_s13), 1  ;;  %s1290_s12 = smov (!%p186_p6, %s869_s12), 1 }
  0x11   : > { %744 = vmatpush1.bf16.msra.mxu0 %v743_v14  ;;  %v214_v32 = vld [vmem:[%s1274_s1 + $0x90] sm:$0xff]  ;;  %v707_v34 = vpack.c.bf16 %v639_v29, %v637_v28  ;;  %v219_v37 = vld [vmem:[%s1274_s1 + $0xb8] sm:$0xff]  ;;  %v642_v38 = vld [vmem:[%s1274_s1 + $0x128] sm:$0xff]  ;;  %s805_s27 = smul.u32 24, %s1288_s13  ;;  %s631_s21 = sshll.u32 %s1290_s12, 1 }
  0x12   : > { %746 = vmatprep.subr.bf16.mxu0 %v745_v15  ;;  %706 = vmatprep.subr.bf16.mxu1 %v705_v33  ;;  %v644_v39 = vld [vmem:[%s1274_s1 + $0x138] sm:$0xff]  ;;  %v641_v40 = vld [vmem:[%s1274_s1 + $0x120] sm:$0xff]  ;;  %v643_v41 = vld [vmem:[%s1274_s1 + $0x130] sm:$0xff]  ;;  %v755_v44 = vpack.c.bf16 %v214_v32, %v212_v31  ;;  %v757_v48 = vpack.c.bf16 %v219_v37, %v217_v36  ;;  %s632_s22 = sshll.u32 %s1288_s13, 2 }
  0x13   : > { %708 = vmatpush1.bf16.msra.mxu1 %v707_v34  ;;  %v709_v42 = vpack.c.bf16 %v644_v39, %v642_v38  ;;  %v711_v43 = vpack.c.bf16 %v643_v41, %v641_v40  ;;  %v216_v45 = vld [vmem:[%s1274_s1 + $0xa0] sm:$0xff]  ;;  %v646_v46 = vld [vmem:[%s1274_s1 + $0x148] sm:$0xff]  ;;  %v648_v47 = vld [vmem:[%s1274_s1 + $0x158] sm:$0xff]  ;;  %s183_s26 = scalar_lea.vmem %s1273_s0, %s805_s27  ;;  %s190_s23 = sadd.s32 %s632_s22, %s631_s21 }
  0x14   : > { %v218_v49 = vld [vmem:[%s1274_s1 + $0xb0] sm:$0xff]  ;;  %v713_v50 = vpack.c.bf16 %v648_v47, %v646_v46  ;;  %v645_v51 = vld [vmem:[%s1274_s1 + $0x140] sm:$0xff]  ;;  %v221_v53 = vld [vmem:[%s1274_s1 + $0xc8] sm:$0xff]  ;;  %s1123_s27 = scalar_lea.vmem %s183_s26, %s634_s28  ;;  %s633_s26 = sshll.u32 %s190_s23, 3 }
  0x15   : > { %748 = vmatpush1.bf16.msra.mxu0 %v747_v20  ;;  %710 = vmatprep.subr.bf16.mxu1 %v709_v42  ;;  %v647_v52 = vld [vmem:[%s1274_s1 + $0x150] sm:$0xff]  ;;  %v223_v54 = vld [vmem:[%s1274_s1 + $0xd8] sm:$0xff]  ;;  %v650_v56 = vld [vmem:[%s1274_s1 + $0x168] sm:$0xff]  ;;  %v759_v58 = vpack.c.bf16 %v218_v49, %v216_v45  ;;  %s192_s29 = scalar_lea.vmem %s1276_s3, %s633_s26 }
  0x16   : > { %750 = vmatprep.subr.bf16.mxu0 %v749_v21  ;;  %v715_v55 = vpack.c.bf16 %v647_v52, %v645_v51  ;;  %v652_v57 = vld [vmem:[%s1274_s1 + $0x178] sm:$0xff]  ;;  %v649_v60 = vld [vmem:[%s1274_s1 + $0x160] sm:$0xff]  ;;  %v651_v61 = vld [vmem:[%s1274_s1 + $0x170] sm:$0xff]  ;;  %v761_v62 = vpack.c.bf16 %v223_v54, %v221_v53 }
  0x17   : > { %712 = vmatpush1.bf16.msra.mxu1 %v711_v43  ;;  %v717_v59 = vpack.c.bf16 %v652_v57, %v650_v56  ;;  %v220_v63 = vld [vmem:[%s1274_s1 + $0xc0] sm:$0xff]  ;;  %v222_v0 = vld [vmem:[%s1274_s1 + $0xd0] sm:$0xff]  ;;  %v654_v1 = vld [vmem:[%s1274_s1 + $0x188] sm:$0xff]  ;;  %v719_v5 = vpack.c.bf16 %v651_v61, %v649_v60 }
  0x18   : > { %714 = vmatprep.subr.bf16.mxu1 %v713_v50  ;;  %v225_v2 = vld [vmem:[%s1274_s1 + $0xe8] sm:$0xff]  ;;  %v227_v3 = vld [vmem:[%s1274_s1 + $0xf8] sm:$0xff]  ;;  %v763_v6 = vpack.c.bf16 %v222_v0, %v220_v63  ;;  %v224_v8 = vld [vmem:[%s1274_s1 + $0xe0] sm:$0xff] }
  0x19   : > { %752 = vmatpush1.bf16.msra.mxu0 %v751_v30  ;;  %v656_v4 = vld [vmem:[%s1274_s1 + $0x198] sm:$0xff]  ;;  %v653_v10 = vld [vmem:[%s1274_s1 + $0x180] sm:$0xff]  ;;  %v655_v11 = vld [vmem:[%s1274_s1 + $0x190] sm:$0xff]  ;;  %v765_v12 = vpack.c.bf16 %v227_v3, %v225_v2 }
  0x1a   : > { %754 = vmatprep.subr.bf16.mxu0 %v753_v35  ;;  %v721_v9 = vpack.c.bf16 %v656_v4, %v654_v1  ;;  %v226_v13 = vld [vmem:[%s1274_s1 + $0xf0] sm:$0xff]  ;;  %v658_v14 = vld [vmem:[%s1274_s1 + $0x1a8] sm:$0xff]  ;;  %v660_v15 = vld [vmem:[%s1274_s1 + $0x1b8] sm:$0xff]  ;;  %v723_v18 = vpack.c.bf16 %v655_v11, %v653_v10 }
  0x1b   : > { %716 = vmatpush1.bf16.msra.mxu1 %v715_v55  ;;  %v672_v16 = vld [vmem:[%s1274_s1 + $0x208] sm:$0xff]  ;;  %v674_v17 = vld [vmem:[%s1274_s1 + $0x218] sm:$0xff]  ;;  %v767_v19 = vpack.c.bf16 %v226_v13, %v224_v8  ;;  %v671_v20 = vld [vmem:[%s1274_s1 + $0x200] sm:$0xff]  ;;  %v725_v21 = vpack.c.bf16 %v660_v15, %v658_v14 }
  0x1c   : > { %718 = vmatprep.subr.bf16.mxu1 %v717_v59  ;;  %v657_v22 = vld [vmem:[%s1274_s1 + $0x1a0] sm:$0xff]  ;;  %v659_v23 = vld [vmem:[%s1274_s1 + $0x1b0] sm:$0xff]  ;;  %v769_v24 = vpack.c.bf16 %v674_v17, %v672_v16  ;;  %v662_v26 = vld [vmem:[%s1274_s1 + $0x1c8] sm:$0xff] }
  0x1d   : > { %756 = vmatpush1.bf16.msra.mxu0 %v755_v44  ;;  %v673_v25 = vld [vmem:[%s1274_s1 + $0x210] sm:$0xff]  ;;  %v664_v27 = vld [vmem:[%s1274_s1 + $0x1d8] sm:$0xff]  ;;  %v676_v28 = vld [vmem:[%s1274_s1 + $0x228] sm:$0xff]  ;;  %v727_v31 = vpack.c.bf16 %v659_v23, %v657_v22  ;;  %v517_v23 = vlaneseq }
  0x1e   : > { %758 = vmatprep.subr.bf16.mxu0 %v757_v48  ;;  %v678_v29 = vld [vmem:[%s1274_s1 + $0x238] sm:$0xff]  ;;  %v195_v30 = vld [vmem:[%s1123_s27] sm:$0xff]  ;;  %v771_v32 = vpack.c.bf16 %v673_v25, %v671_v20  ;;  %v729_v34 = vpack.c.bf16 %v664_v27, %v662_v26  ;;  %v663_v36 = vld [vmem:[%s1274_s1 + $0x1d0] sm:$0xff] }
  0x1f   : > { %720 = vmatpush1.bf16.msra.mxu1 %v719_v5  ;;  %v675_v33 = vld [vmem:[%s1274_s1 + $0x220] sm:$0xff]  ;;  %v773_v37 = vpack.c.bf16 %v678_v29, %v676_v28  ;;  %v677_v38 = vld [vmem:[%s1274_s1 + $0x230] sm:$0xff]  ;;  %v666_v39 = vld [vmem:[%s1274_s1 + $0x1e8] sm:$0xff] }
  0x20   : > { %722 = vmatprep.subr.bf16.mxu1 %v721_v9  ;;  %v661_v35 = vld [vmem:[%s1274_s1 + $0x1c0] sm:$0xff]  ;;  %v668_v40 = vld [vmem:[%s1274_s1 + $0x1f8] sm:$0xff]  ;;  %v680_v41 = vld [vmem:[%s1274_s1 + $0x248] sm:$0xff]  ;;  %v775_v44 = vpack.c.bf16 %v677_v38, %v675_v33 }
  0x21   : > { %760 = vmatpush1.bf16.msra.mxu0 %v759_v58  ;;  %v682_v42 = vld [vmem:[%s1274_s1 + $0x258] sm:$0xff]  ;;  %v731_v43 = vpack.c.bf16 %v663_v36, %v661_v35  ;;  %v733_v45 = vpack.c.bf16 %v668_v40, %v666_v39  ;;  %v665_v46 = vld [vmem:[%s1274_s1 + $0x1e0] sm:$0xff]  ;;  %v667_v47 = vld [vmem:[%s1274_s1 + $0x1f0] sm:$0xff] }
  0x22   : > { %762 = vmatprep.subr.bf16.mxu0 %v761_v62  ;;  %v777_v48 = vpack.c.bf16 %v682_v42, %v680_v41  ;;  %v679_v49 = vld [vmem:[%s1274_s1 + $0x240] sm:$0xff]  ;;  %v681_v50 = vld [vmem:[%s1274_s1 + $0x250] sm:$0xff]  ;;  %v684_v51 = vld [vmem:[%s1274_s1 + $0x268] sm:$0xff]  ;;  %v735_v53 = vpack.c.bf16 %v667_v47, %v665_v46 }
  0x23   : > { %724 = vmatpush1.bf16.msra.mxu1 %v723_v18  ;;  %v686_v52 = vld [vmem:[%s1274_s1 + $0x278] sm:$0xff]  ;;  %v779_v54 = vpack.c.bf16 %v681_v50, %v679_v49  ;;  %v683_v56 = vld [vmem:[%s1274_s1 + $0x260] sm:$0xff]  ;;  %v688_v57 = vld [vmem:[%s1274_s1 + $0x288] sm:$0xff] }
  0x24   : > { %726 = vmatprep.subr.bf16.mxu1 %v725_v21  ;;  %v781_v55 = vpack.c.bf16 %v686_v52, %v684_v51  ;;  %v690_v58 = vld [vmem:[%s1274_s1 + $0x298] sm:$0xff]  ;;  %v636_v59 = vld [vmem:[%s1123_s27 + $0x1] sm:$0xff]  ;;  %v689_v63 = vld [vmem:[%s1274_s1 + $0x290] sm:$0xff] }
  0x25   : > { %764 = vmatpush1.bf16.msra.mxu0 %v763_v6  ;;  %v785_v61 = vpack.c.bf16 %v690_v58, %v688_v57  ;;  %v687_v62 = vld [vmem:[%s1274_s1 + $0x280] sm:$0xff]  ;;  %v692_v0 = vld [vmem:[%s1274_s1 + $0x2a8] sm:$0xff]  ;;  %v694_v1 = vld [vmem:[%s1274_s1 + $0x2b8] sm:$0xff] }
  0x26   : > { %766 = vmatprep.subr.bf16.mxu0 %v765_v12  ;;  %v787_v2 = vpack.c.bf16 %v689_v63, %v687_v62  ;;  %v789_v3 = vpack.c.bf16 %v694_v1, %v692_v0  ;;  %v691_v4 = vld [vmem:[%s1274_s1 + $0x2a0] sm:$0xff]  ;;  %v693_v5 = vld [vmem:[%s1274_s1 + $0x2b0] sm:$0xff]  ;;  %v696_v6 = vld [vmem:[%s1274_s1 + $0x2c8] sm:$0xff] }
  0x27   : > { %728 = vmatpush1.bf16.msra.mxu1 %v727_v31  ;;  %v698_v8 = vld [vmem:[%s1274_s1 + $0x2d8] sm:$0xff]  ;;  %v791_v9 = vpack.c.bf16 %v693_v5, %v691_v4  ;;  %v695_v11 = vld [vmem:[%s1274_s1 + $0x2c0] sm:$0xff]  ;;  %v697_v12 = vld [vmem:[%s1274_s1 + $0x2d0] sm:$0xff] }
  0x28   : > { %730 = vmatprep.subr.bf16.mxu1 %v729_v34  ;;  %v793_v10 = vpack.c.bf16 %v698_v8, %v696_v6  ;;  %v700_v13 = vld [vmem:[%s1274_s1 + $0x2e8] sm:$0xff]  ;;  %v702_v14 = vld [vmem:[%s1274_s1 + $0x2f8] sm:$0xff]  ;;  %v795_v15 = vpack.c.bf16 %v697_v12, %v695_v11  ;;  %v699_v17 = vld [vmem:[%s1274_s1 + $0x2e0] sm:$0xff] }
  0x29   : > { %768 = vmatpush1.bf16.msra.mxu0 %v767_v19  ;;  %v797_v16 = vpack.c.bf16 %v702_v14, %v700_v13  ;;  %v701_v18 = vld [vmem:[%s1274_s1 + $0x2f0] sm:$0xff]  ;;  %v670_v20 = vld [vmem:[%s1123_s27 + $0x2] sm:$0xff]  ;;  %v515_v26 = vld [vmem:[%s1275_s2] sm:$0x3] }
  0x2a   : > { %770 = vmatprep.subr.bf16.mxu0 %v769_v24  ;;  %v799_v19 = vpack.c.bf16 %v701_v18, %v699_v17  ;;  %v518_v24 = vshrl.u32 %v517_v23, 7 }
  0x2b   : > { %732 = vmatpush1.bf16.msra.mxu1 %v731_v43 }
  0x2c   : > { %400 = vmatmul.mubr.f32.vlgmr.msra.gmra.mrb[0].mxu0 %v195_v30  ;;  %734 = vmatprep.subr.bf16.mxu1 %v733_v45  ;;  %v519_v25 = vsub.s32 0, %v518_v24  ;;  %v523_v27 = vsub.s32 1, %v518_v24 }
  0x2d   : > { %772 = vmatpush1.bf16.msra.mxu0 %v771_v32  ;;  %506 = vmatprep.mubr.f32.mxu0 %v887_v7  ;;  %v685_v7 = vld [vmem:[%s1274_s1 + $0x270] sm:$0xff] }
  0x2e   : > { %774 = vmatprep.subr.bf16.mxu0 %v773_v37  ;;  %v783_v60 = vpack.c.bf16 %v685_v7, %v683_v56  ;;  %v520_v28 = vrot.slane %v515_v26, %v519_v25  ;;  %v524_v30 = vrot.slane %v515_v26, %v523_v27 }
  0x2f   : > { %736 = vmatpush1.bf16.msra.mxu1 %v735_v53 }
  0x31   : > { %776 = vmatpush1.bf16.msra.mxu0 %v775_v44 }
  0x32   : > { %778 = vmatprep.subr.bf16.mxu0 %v777_v48  ;;  %329 = vmatmul.mubr.f32.vlgmr.msra.gmra.mrb[0].mxu1 %v636_v59 }
  0x35   : > { %780 = vmatpush1.bf16.msra.mxu0 %v779_v54 }
  0x36   : > { %782 = vmatprep.subr.bf16.mxu0 %v781_v55 }
  0x39   : > { %784 = vmatpush1.bf16.msra.mxu0 %v783_v60 }
  0x3a   : > { %786 = vmatprep.subr.bf16.mxu0 %v785_v61 }
  0x3d   : > { %788 = vmatpush1.bf16.msra.mxu0 %v787_v2 }
  0x3e   : > { %790 = vmatprep.subr.bf16.mxu0 %v789_v3 }
  0x41   : > { %792 = vmatpush1.bf16.msra.mxu0 %v791_v9 }
  0x42   : > { %794 = vmatprep.subr.bf16.mxu0 %v793_v10 }
  0x45   : > { %796 = vmatpush1.bf16.msra.mxu0 %v795_v15 }
  0x46   : > { %798 = vmatprep.subr.bf16.mxu0 %v797_v16 }
  0x49   : > { %800 = vmatpush1.bf16.msra.mxu0 %v799_v19 }
  0x4c   : > { %507 = vmatmul.mubr.f32.vlgmr.msra.gmra.mrb[0].mxu0 %v670_v20 }
 0x105   : > { %v330_v21 = vpop.f32.mrb[0].mxu1 }
 0x106   : > { %v332_v22 = vpop.f32.mrb[1].mxu1 }
 0x11f   : > { %v508_v29 = vpop.f32.mrb[0].mxu0 }
 0x120   : > { %v801_v31 = vadd.f32 %v508_v29, %v330_v21  ;;  %v510_v32 = vpop.f32.mrb[1].mxu0 }
 0x121   : > { %v802_v33 = vadd.f32 %v510_v32, %v332_v22 }
 0x122   : > { %v527_v34 = vadd.f32 %v801_v31, %v520_v28 }
 0x123   : > { %v528_v35 = vadd.f32 %v802_v33, %v524_v30 }
 0x124   : > { %529 = vst [vmem:[%s192_s29] sm:$0xff] %v527_v34 }
 0x125   : > { %530 = vst [vmem:[%s192_s29 + $0x8] sm:$0xff] %v528_v35 }
 0x126 PF: > { %s13_s16 = sadd.s32 1, %s885_s16   ;;  %s1277_s12 = smov %s877_s14 }
 0x127   : > { %p10_p7 = scmp.ge.s32.totalorder %s13_s16, 6   ;;  %s1278_s13 = smov %s881_s15 }
 0x128   : > { %s1279_s14 = smov %s1282_s17  ;;  %s1280_s15 = smov %s1286_s18 }
 0x129   :  { %12 = sbr.rel (!%p10_p7) target bundleno = 3 (0x3), region = 67 }

</bundles_post_ra>
